<compile_context>
chip_gen: v6e
topology: v6e:2x2x1
jax: 0.10.0
libtpu: 0.0.40
codegen_flags: <defaults>
</compile_context>

<pallas_src>
import functools
import math

import jax
import jax.numpy as jnp
from jax.experimental import pallas as pl
from jax.experimental.pallas import tpu as pltpu

NUM_CLASSES = 10                       # fixed by torch.nn.functional.one_hot(labels, 10)
_NEG_LOG_CLAMP = -math.log(1e-34)      # -log(clamp floor) ~= 78.2958


def _round_up(x, m):
    return (x + m - 1) // m * m


def _closs_kernel(x_ref, lab_ref, loss_ref, acc_ref, *, a, b, c, n_valid):
    step = pl.program_id(0)

    @pl.when(step == 0)
    def _init():
        acc_ref[0] = jnp.float32(0.0)

    x = x_ref[...].astype(jnp.float32)        # (C, TILE_N): classes on sublanes, batch on lanes
    labels = lab_ref[...]                     # (1, TILE_N) int32
    cdim, tile_n = x.shape

    # Validity mask for padded batch columns (lane-dense).
    col = jax.lax.broadcasted_iota(jnp.int32, (1, tile_n), 1) + step * tile_n
    valid = (col < n_valid).astype(jnp.float32)               # (1, TILE_N)

    # One-hot membership via sublane iota compare (TPU needs >=2D iota).
    row = jax.lax.broadcasted_iota(jnp.int32, (cdim, tile_n), 0)
    is_label = row == labels                                   # (C, TILE_N)

    # Per-column logsumexp pieces — single exp pass over (C, TILE_N).
    m = jnp.max(x, axis=0, keepdims=True)                      # (1, TILE_N)
    e = jnp.exp(x - m)                                         # (C, TILE_N)
    e_label = jnp.sum(jnp.where(is_label, e, 0.0), axis=0, keepdims=True)
    s_other = jnp.sum(jnp.where(is_label, 0.0, e), axis=0, keepdims=True)  # stable 1-p_label
    s = e_label + s_other
    log_s = jnp.log(s)

    x_label = jnp.sum(jnp.where(is_label, x, 0.0), axis=0, keepdims=True)  # gathered logit

    # l1 per column: lse - x_label
    l1_col = (m + log_s) - x_label
    # l2 per column: -log(1 - p_label) = log(s) - log(sum_{j != y} e_j)
    l2_col = log_s - jnp.log(s_other)
    # l3 contributes -c*NEG_LOG_CLAMP*p_label per column (plus a constant at finalize)
    p_label = e_label / s

    combined = a * l1_col + b * l2_col - (c * _NEG_LOG_CLAMP) * p_label
    acc_ref[0] += jnp.sum(combined * valid)                    # one reduce / step

    @pl.when(step == pl.num_programs(0) - 1)
    def _finalize():
        loss_ref[0] = acc_ref[0] * (1.0 / n_valid) + c * _NEG_LOG_CLAMP


def closs(outputs, labels, a, b, c, *, max_tile_n=4096):
    """outputs: (N, 10) float (f32 or bf16); labels: (N,) int. Returns scalar f32 loss."""
    n, cdim = outputs.shape

    # Lane-dense layout: classes (10) on sublanes, batch on lanes.
    x_t = jnp.transpose(outputs)                     # (C, N)
    labels = labels.astype(jnp.int32)

    tile = min(_round_up(max_tile_n, 128), _round_up(n, 128))
    n_pad = _round_up(n, tile)
    if n_pad != n:
        x_t = jnp.pad(x_t, ((0, 0), (0, n_pad - n)))
        labels = jnp.pad(labels, (0, n_pad - n))
    labels2d = labels.reshape(1, n_pad)              # lane-dense labels

    grid = (n_pad // tile,)
    kernel = functools.partial(
        _closs_kernel, a=float(a), b=float(b), c=float(c), n_valid=n)

    cost = pl.CostEstimate(
        flops=14 * n * cdim,
        transcendentals=n * cdim + 3 * n,            # exp matrix + per-column logs/div
        bytes_accessed=n * cdim * outputs.dtype.itemsize + n * 4 + 4,
    )

    loss = pl.pallas_call(
        kernel,
        out_shape=jax.ShapeDtypeStruct((1,), jnp.float32),
        grid=grid,
        in_specs=[
            pl.BlockSpec((cdim, tile), lambda i: (0, i)),   # logits tile (C, TILE_N)
            pl.BlockSpec((1, tile), lambda i: (0, i)),      # labels tile (1, TILE_N)
        ],
        out_specs=pl.BlockSpec(memory_space=pltpu.MemorySpace.SMEM),  # scalar loss
        scratch_shapes=[pltpu.SMEM((1,), jnp.float32)],               # fused partial sum
        compiler_params=pltpu.CompilerParams(
            dimension_semantics=("arbitrary",),      # grid axis carries the accumulator
        ),
        cost_estimate=cost,
    )(x_t, labels2d)
    return loss[0]


def _closs_ref(outputs, labels, a, b, c):
    """Pure-JAX reference mirroring the PyTorch forward."""
    x = outputs.astype(jnp.float32)
    log_p = jax.nn.log_softmax(x, axis=1)
    p = jax.nn.softmax(x, axis=1)
    onehot = jax.nn.one_hot(labels, NUM_CLASSES, dtype=jnp.float32)
    l1 = -jnp.mean(jnp.sum(onehot * log_p, axis=1))
    p_label = jnp.sum(onehot * p, axis=1)
    l2 = jnp.mean(-jnp.log(1.0 - p_label))
    l3 = -jnp.mean(jnp.sum(p * jnp.log(jnp.clip(onehot, 1e-34, 1.0)), axis=1))
    return a * l1 + b * l2 + c * l3


if __name__ == "__main__":
    key = jax.random.PRNGKey(0)
    k_out, k_lab, k_out2, k_lab2 = jax.random.split(key, 4)
    a, b, c = 1.0, 0.5, 0.1

    # Small example: batch=8, num_classes=10 (fixed by one_hot(..., 10)).
    N = 8
    outputs = jax.random.normal(k_out, (N, NUM_CLASSES), dtype=jnp.float32)
    labels = jax.random.randint(k_lab, (N,), 0, NUM_CLASSES, dtype=jnp.int32)

    loss = jax.block_until_ready(closs(outputs, labels, a, b, c))
    ref = jax.block_until_ready(_closs_ref(outputs, labels, a, b, c))
    assert jnp.allclose(loss, ref, rtol=1e-5, atol=1e-4), (loss, ref)

    # Second check: non-multiple-of-tile batch exercising the multi-step grid,
    # SMEM accumulation across steps and padded-column masking.
    N2 = 272
    outputs2 = jax.random.normal(k_out2, (N2, NUM_CLASSES), dtype=jnp.float32)
    labels2 = jax.random.randint(k_lab2, (N2,), 0, NUM_CLASSES, dtype=jnp.int32)

    loss2 = jax.block_until_ready(closs(outputs2, labels2, a, b, c, max_tile_n=128))
    ref2 = jax.block_until_ready(_closs_ref(outputs2, labels2, a, b, c))
    assert jnp.allclose(loss2, ref2, rtol=1e-4, atol=1e-4), (loss2, ref2)

    print("KERNEL_OK")
</pallas_src>

<mosaic_0001>
module attributes {stable_mosaic.version = 11 : i64} {
  func.func @_closs_kernel(%arg0: i32, %arg1: memref<10x128xf32, #tpu.memory_space<vmem>>, %arg2: memref<1x128xi32, #tpu.memory_space<vmem>>, %arg3: memref<1xf32, #tpu.memory_space<smem>>, %arg4: memref<1xf32, #tpu.memory_space<smem>>) attributes {dimension_semantics = [#tpu.dimension_semantics<arbitrary>], iteration_bounds = array<i64: 1>, scalar_prefetch = 0 : i64, scratch_operands = 1 : i64, tpu.core_type = #tpu.core_type<tc>, window_params = [{transform_indices = @transform_0, window_bounds = array<i64: 10, 128>}, {transform_indices = @transform_1, window_bounds = array<i64: 1, 128>}, {transform_indices = @transform_2, window_bounds = array<i64: 1>}]} {
    %c0_i32 = arith.constant 0 : i32
    %0 = arith.cmpi eq, %arg0, %c0_i32 : i32
    %1 = arith.extui %0 : i1 to i32
    %c0_i32_0 = arith.constant 0 : i32
    %2 = arith.cmpi ne, %1, %c0_i32_0 : i32
    scf.if %2 {
      %cst_18 = arith.constant 0.000000e+00 : f32
      %c0_19 = arith.constant 0 : index
      %59 = memref.load %arg4[%c0_19] : memref<1xf32, #tpu.memory_space<smem>>
      memref.store %cst_18, %arg4[%c0_19] : memref<1xf32, #tpu.memory_space<smem>>
    } else {
    }
    %c0 = arith.constant 0 : index
    %c0_1 = arith.constant 0 : index
    %3 = vector.load %arg1[%c0, %c0_1] : memref<10x128xf32, #tpu.memory_space<vmem>>, vector<10x128xf32>
    %c0_2 = arith.constant 0 : index
    %c0_3 = arith.constant 0 : index
    %4 = vector.load %arg2[%c0_2, %c0_3] : memref<1x128xi32, #tpu.memory_space<vmem>>, vector<1x128xi32>
    %5 = tpu.iota {dimensions = array<i32: 1>} : vector<1x128xi32>
    %c128_i32 = arith.constant 128 : i32
    %6 = arith.muli %arg0, %c128_i32 : i32
    %7 = vector.broadcast %6 : i32 to vector<1x128xi32>
    %8 = arith.addi %5, %7 : vector<1x128xi32>
    %c8_i32 = arith.constant 8 : i32
    %9 = vector.broadcast %c8_i32 : i32 to vector<1x128xi32>
    %10 = arith.cmpi slt, %8, %9 : vector<1x128xi32>
    %11 = arith.extui %10 : vector<1x128xi1> to vector<1x128xi32>
    %12 = arith.sitofp %11 : vector<1x128xi32> to vector<1x128xf32>
    %13 = tpu.iota {dimensions = array<i32: 0>} : vector<10x128xi32>
    %14 = vector.broadcast %4 : vector<1x128xi32> to vector<10x128xi32>
    %15 = arith.cmpi eq, %13, %14 : vector<10x128xi32>
    %cst = arith.constant dense<0xFF800000> : vector<128xf32>
    %16 = vector.multi_reduction <maximumf>, %3, %cst [0] : vector<10x128xf32> to vector<128xf32>
    %17 = vector.shape_cast %16 : vector<128xf32> to vector<1x128xf32>
    %18 = vector.broadcast %17 : vector<1x128xf32> to vector<10x128xf32>
    %19 = arith.subf %3, %18 : vector<10x128xf32>
    %20 = math.exp %19 : vector<10x128xf32>
    %cst_4 = arith.constant 0.000000e+00 : f32
    %21 = vector.broadcast %cst_4 : f32 to vector<10x128xf32>
    %22 = arith.select %15, %20, %21 : vector<10x128xi1>, vector<10x128xf32>
    %cst_5 = arith.constant dense<0.000000e+00> : vector<128xf32>
    %23 = vector.multi_reduction <add>, %22, %cst_5 [0] : vector<10x128xf32> to vector<128xf32>
    %24 = vector.shape_cast %23 : vector<128xf32> to vector<1x128xf32>
    %cst_6 = arith.constant 0.000000e+00 : f32
    %25 = vector.broadcast %cst_6 : f32 to vector<10x128xf32>
    %26 = arith.select %15, %25, %20 : vector<10x128xi1>, vector<10x128xf32>
    %cst_7 = arith.constant dense<0.000000e+00> : vector<128xf32>
    %27 = vector.multi_reduction <add>, %26, %cst_7 [0] : vector<10x128xf32> to vector<128xf32>
    %28 = vector.shape_cast %27 : vector<128xf32> to vector<1x128xf32>
    %29 = arith.addf %24, %28 : vector<1x128xf32>
    %30 = math.log %29 : vector<1x128xf32>
    %cst_8 = arith.constant 0.000000e+00 : f32
    %31 = vector.broadcast %cst_8 : f32 to vector<10x128xf32>
    %32 = arith.select %15, %3, %31 : vector<10x128xi1>, vector<10x128xf32>
    %cst_9 = arith.constant dense<0.000000e+00> : vector<128xf32>
    %33 = vector.multi_reduction <add>, %32, %cst_9 [0] : vector<10x128xf32> to vector<128xf32>
    %34 = vector.shape_cast %33 : vector<128xf32> to vector<1x128xf32>
    %35 = arith.addf %17, %30 : vector<1x128xf32>
    %36 = arith.subf %35, %34 : vector<1x128xf32>
    %37 = math.log %28 : vector<1x128xf32>
    %38 = arith.subf %30, %37 : vector<1x128xf32>
    %39 = arith.divf %24, %29 : vector<1x128xf32>
    %cst_10 = arith.constant 1.000000e+00 : f32
    %40 = vector.broadcast %cst_10 : f32 to vector<1x128xf32>
    %41 = arith.mulf %40, %36 : vector<1x128xf32>
    %cst_11 = arith.constant 5.000000e-01 : f32
    %42 = vector.broadcast %cst_11 : f32 to vector<1x128xf32>
    %43 = arith.mulf %42, %38 : vector<1x128xf32>
    %44 = arith.addf %41, %43 : vector<1x128xf32>
    %cst_12 = arith.constant 7.82878923 : f32
    %45 = vector.broadcast %cst_12 : f32 to vector<1x128xf32>
    %46 = arith.mulf %45, %39 : vector<1x128xf32>
    %47 = arith.subf %44, %46 : vector<1x128xf32>
    %c0_13 = arith.constant 0 : index
    %48 = memref.load %arg4[%c0_13] : memref<1xf32, #tpu.memory_space<smem>>
    %49 = arith.mulf %47, %12 : vector<1x128xf32>
    %50 = vector.shape_cast %49 : vector<1x128xf32> to vector<1x1x128xf32>
    %cst_14 = arith.constant dense<0.000000e+00> : vector<1xf32>
    %51 = vector.multi_reduction <add>, %50, %cst_14 [1, 2] : vector<1x1x128xf32> to vector<1xf32>
    %52 = vector.shape_cast %51 : vector<1xf32> to vector<1x1x1xf32>
    %53 = vector.extract %52[0, 0, 0] : f32 from vector<1x1x1xf32>
    %54 = arith.addf %48, %53 : f32
    %c0_15 = arith.constant 0 : index
    %55 = memref.load %arg4[%c0_15] : memref<1xf32, #tpu.memory_space<smem>>
    memref.store %54, %arg4[%c0_15] : memref<1xf32, #tpu.memory_space<smem>>
    %c0_i32_16 = arith.constant 0 : i32
    %56 = arith.cmpi eq, %arg0, %c0_i32_16 : i32
    %57 = arith.extui %56 : i1 to i32
    %c0_i32_17 = arith.constant 0 : i32
    %58 = arith.cmpi ne, %57, %c0_i32_17 : i32
    scf.if %58 {
      %c0_18 = arith.constant 0 : index
      %59 = memref.load %arg4[%c0_18] : memref<1xf32, #tpu.memory_space<smem>>
      %cst_19 = arith.constant 1.250000e-01 : f32
      %60 = arith.mulf %59, %cst_19 : f32
      %cst_20 = arith.constant 7.82878923 : f32
      %61 = arith.addf %60, %cst_20 : f32
      %c0_21 = arith.constant 0 : index
      %62 = memref.load %arg3[%c0_21] : memref<1xf32, #tpu.memory_space<smem>>
      memref.store %61, %arg3[%c0_21] : memref<1xf32, #tpu.memory_space<smem>>
    } else {
    }
    return
  }
  func.func @transform_0(%arg0: i32) -> (i32, i32) {
    %c0_i32 = arith.constant 0 : i32
    %c0_i32_0 = arith.constant 0 : i32
    return %c0_i32, %arg0 : i32, i32
  }
  func.func @transform_1(%arg0: i32) -> (i32, i32) {
    %c0_i32 = arith.constant 0 : i32
    %c0_i32_0 = arith.constant 0 : i32
    return %c0_i32, %arg0 : i32, i32
  }
  func.func @transform_2(%arg0: i32) -> i32 {
    %c0_i32 = arith.constant 0 : i32
    %c0_i32_0 = arith.constant 0 : i32
    return %c0_i32 : i32
  }
}

</mosaic_0001>

<bundles_post_ra>
// kernel: tpu_custom_call.1
= control target key start
LH: loop header
LB: loop body
LE: loop exit
PB: predicated region body
PF: predicated region fallthrough
CT: control target
= control target key end

     0   :  { %7 = vsyncpa [#allocation4], 0  ;;  %s233_s0 = inlined_call_operand.hbm [shape: f32[10,128], index: 0, kind: input, shape index: {}]   ;;  %s234_s1 = inlined_call_operand.vmem [shape: s32[1,128], index: 1, kind: input, shape index: {}]   ;;  %s235_s2 = inlined_call_operand.hbm [shape: f32[1], index: 2, kind: output, shape index: {}]  }
   0x1   :  { %8 = vsyncpa [#allocation5], 0  ;;  %s200_s9 = smov [#allocation3]  }
   0x2   :  { %s14_s10 = sshll.u32 %s200_s9, 4  ;;  %s15_s10 = int_to_ptr.vmem [resolvable:$true] %s14_s10 }
   0x3   :  { %s176_s11 = scalar_lea.vmem %s15_s10, 256  ;;  %p181_p1 = scmp.lt.s32.totalorder %s15_s10, %s15_s10 }
   0x4   :  { %p177_p0 = scmp.ne.s32.totalorder %s15_s10, %s176_s11  ;;  %p182_p2 = scmp.lt.s32.totalorder %s176_s11, %s176_s11 }
   0x6   :  { %p183_p3 = por %p182_p2, %p181_p1 }
   0x8   :  { %p184_p4 = pnand %p183_p3, %p177_p0 }
   0xa   :  { %187 = shalt.err (!%p184_p4)
}
   0xb   :  { %s201_s12 = smov 128   ;;  %s202_s13 = smov 8  }
   0xc   :  { %20 = dma.hbm_to_vmem [thread:$0]  %s233_s0, 256, %s15_s10, [#allocation4], %s201_s12, %s201_s12, %s202_s13  }
   0xd   :  { %196 = dma.done.wait [#allocation4], 256  }
   0xe   :  { %197 = vsyncadd [#allocation4], 4294967040  ;;  %vm52_vm0 = vcmask 1041408   ;;  %v32_v0 = vld [vmem:[#allocation3] sm:$0xff]  ;;  %v33_v1 = vld [vmem:[#allocation3 + $0x8] sm:$0x3]  ;;  %v35_v14 = vlaneseq }
   0xf   :  { %v53_v2 = vsel %vm52_vm0, %v33_v1, -inf  ;;  %v150_v16 = vld [vmem:[%s234_s1] ss:$0 sm:$0xff]  ;;  %vm113_vm4 = vcmask 1040384   ;;  %s204_s19 = smov [#allocation6]  }
  0x10   :  { %v54_v3 = vmax.f32 %v32_v0, %v53_v2  ;;  %v44_v15 = vshrl.u32 %v35_v14, 7  ;;  %v36_v54 = vand.u32 127, %v35_v14 }
  0x12   :  { %v55_v4 = vrot.slane %v54_v3, 4  ;;  %v45_v17 = vadd.s32 8, %v44_v15  ;;  %vm50_vm1 = vcmp.eq.s32.totalorder %v44_v15, %v150_v16  ;;  %vm40_vm3 = vcmp.lt.s32.totalorder %v36_v54, 8 }
  0x13   :  { %v90_v31 = vsel %vm50_vm1, %v32_v0, 0.0 }
  0x14   :  { %v56_v5 = vmax.f32 %v54_v3, %v55_v4  ;;  %vm51_vm2 = vcmp.eq.s32.totalorder %v45_v17, %v150_v16 }
  0x15   :  { %v91_v28 = vsel %vm51_vm2, %v33_v1, 0.0 }
  0x16   :  { %v57_v6 = vrot.slane %v56_v5, 2  ;;  %v92_v32 = vsel %vm52_vm0, %v91_v28, 0.0 }
  0x17   :  { %v93_v37 = vadd.f32 %v92_v32, %v90_v31 }
  0x18   :  { %v58_v7 = vmax.f32 %v56_v5, %v57_v6 }
  0x19   :  { %v94_v42 = vrot.slane %v93_v37, 4 }
  0x1a   :  { %v59_v8 = vrot.slane %v58_v7, 1 }
  0x1b   :  { %v95_v46 = vadd.f32 %v94_v42, %v93_v37 }
  0x1c   :  { %v60_v9 = vmax.f32 %v58_v7, %v59_v8 }
  0x1d   :  { %v96_v47 = vrot.slane %v95_v46, 2 }
  0x1e   :  { %v61_v10 = vsub.f32 %v32_v0, %v60_v9  ;;  %v62_v11 = vsub.f32 %v33_v1, %v60_v9  ;;  %v203_v0 = vmov 0.0  }
  0x1f   :  { %v97_v48 = vadd.f32 %v96_v47, %v95_v46  ;;  %v149_v1 = vsel %vm40_vm3, 1.0, %v203_v0 }
  0x20   :  { %v63_v12 = vmul.f32 1.442695, %v61_v10  ;;  %v65_v13 = vmul.f32 1.442695, %v62_v11 }
  0x21   :  { %v98_v49 = vrot.slane %v97_v48, 1 }
  0x22   :  { %158 = vpow2.f32 %v63_v12 }
  0x23   :  { %160 = vpow2.f32 %v65_v13  ;;  %v99_v56 = vadd.f32 %v98_v49, %v97_v48 }
  0x2f   :  { %v159_v18 = vpop.eup %158 }
  0x30   :  { %v161_v19 = vpop.eup %160  ;;  %v67_v20 = vsel %vm50_vm1, %v159_v18, 0.0  ;;  %v77_v21 = vsel %vm50_vm1, 0.0, %v159_v18 }
  0x31   :  { %v68_v22 = vsel %vm51_vm2, %v161_v19, 0.0  ;;  %v78_v23 = vsel %vm51_vm2, 0.0, %v161_v19 }
  0x32   :  { %v69_v24 = vsel %vm52_vm0, %v68_v22, 0.0  ;;  %v79_v25 = vsel %vm52_vm0, %v78_v23, 0.0 }
  0x33   :  { %v70_v26 = vadd.f32 %v69_v24, %v67_v20  ;;  %v80_v27 = vadd.f32 %v79_v25, %v77_v21 }
  0x35   :  { %v71_v29 = vrot.slane %v70_v26, 4  ;;  %v81_v30 = vrot.slane %v80_v27, 4 }
  0x37   :  { %v72_v33 = vadd.f32 %v71_v29, %v70_v26  ;;  %v82_v34 = vadd.f32 %v81_v30, %v80_v27 }
  0x39   :  { %v73_v35 = vrot.slane %v72_v33, 2  ;;  %v83_v36 = vrot.slane %v82_v34, 2 }
  0x3b   :  { %v74_v38 = vadd.f32 %v73_v35, %v72_v33  ;;  %v84_v39 = vadd.f32 %v83_v36, %v82_v34 }
  0x3d   :  { %v75_v40 = vrot.slane %v74_v38, 1  ;;  %v85_v41 = vrot.slane %v84_v39, 1 }
  0x3f   :  { %v76_v43 = vadd.f32 %v75_v40, %v74_v38  ;;  %v86_v44 = vadd.f32 %v85_v41, %v84_v39 }
  0x41   :  { %v87_v45 = vadd.f32 %v86_v44, %v76_v43  ;;  %162 = vlog2.f32 %v86_v44 }
  0x43   :  { %164 = vlog2.f32 %v87_v45 }
  0x44   :  { %166 = vrcp.f32 %v87_v45 }
  0x4e   :  { %v163_v50 = vpop.eup %162 }
  0x4f   :  { %v103_v51 = vmul.f32 0.6931472, %v163_v50 }
  0x50   :  { %v165_v52 = vpop.eup %164 }
  0x51   :  { %v167_v53 = vpop.eup %166  ;;  %v89_v55 = vmul.f32 0.6931472, %v165_v52 }
  0x52   :  { %v106_v57 = vmul.f32 %v167_v53, %v76_v43 }
  0x53   :  { %v100_v58 = vadd.f32 %v89_v55, %v60_v9  ;;  %v104_v59 = vsub.f32 %v89_v55, %v103_v51 }
  0x54   :  { %v109_v62 = vmul.f32 7.828789, %v106_v57 }
  0x55   :  { %v101_v60 = vsub.f32 %v100_v58, %v99_v56  ;;  %v107_v61 = vmul.f32 0.5, %v104_v59 }
  0x57   :  { %v108_v63 = vadd.f32 %v107_v61, %v101_v60 }
  0x59   :  { %v110_v2 = vsub.f32 %v108_v63, %v109_v62 }
  0x5b   :  { %v112_v3 = vmul.f32 %v149_v1, %v110_v2 }
  0x5d   :  { %v114_v4 = vsel %vm113_vm4, %v112_v3, 0.0 }
  0x5e   :  { %115 = vadd.xlane.f32.xlu0 %v114_v4 }
  0xe7   :  { %v116_v5 = vpop.xlane.xlu0 %115 }
  0xe8   :  { %v117_v6 = vrot.slane %v116_v5, 4 }
  0xea   :  { %v118_v7 = vadd.f32 %v117_v6, %v116_v5 }
  0xec   :  { %v119_v8 = vrot.slane %v118_v7, 2 }
  0xee   :  { %v120_v10 = vadd.f32 %v119_v8, %v118_v7 }
  0xf0   :  { %v121_v11 = vrot.slane %v120_v10, 1 }
  0xf2   :  { %v122_v9 = vadd.f32 %v121_v11, %v120_v10 }
  0xf4   :  { %151 = vpush %v122_v9 }
 0x125   :  { %s152_s1 = spop %151 }
 0x126   :  { %s131_s17 = smul.f32 0.125, %s152_s1 }
 0x128   :  { %s132_s18 = sadd.f32 7.828789, %s131_s17 }
 0x12a   :  { %134 = sst [smem:[#allocation6]] %s132_s18 }
 0x12b   :  { %142 = dma.smem_to_hbm %s204_s19, 16, %s235_s2, [#allocation5]  }
 0x12c   :  { %198 = dma.done.wait [#allocation5], 16  }
 0x12d   :  { %199 = vsyncadd [#allocation5], 4294967280 }
 0x12e   :  { %146 = sfence }
 0x12f   :  { %147 = vsyncpa [#allocation4], 1 }
 0x130   :  { %148 = vsyncpa [#allocation5], 1 }

</bundles_post_ra>
